<compile_context>
chip_gen: v7x
topology: tpu7x:2x2x1
jax: 0.10.0
libtpu: 0.0.40
codegen_flags: <defaults>
</compile_context>

<pallas_src>
import jax
import jax.numpy as jnp
from jax.experimental import pallas as pl
from jax.experimental.pallas import tpu as pltpu


# ---------------------------------------------------------------------------
# Tiling constants (sized to stay well under the 16 MiB v5e scoped-VMEM default
# even double-buffered; comfortably within v6e/v7x limits).
# ---------------------------------------------------------------------------
_ROW_TILE = 256            # destination-node rows per aggregation step
_K_TILE = 512              # source-node columns of A contracted per step
_LANE = 128                # feature dims padded to full vreg lane width
_NODE_PAD = 512            # N padded to lcm(_ROW_TILE, _K_TILE)


def _round_up(x, m):
    return ((x + m - 1) // m) * m


# ---------------------------------------------------------------------------
# Kernel 1: tiled neighbor aggregation   out = A @ X (+ b)
#   grid = (row_tiles, k_tiles); k is the reduction axis (last, "arbitrary").
#   A streamed as bf16 (exact for 0/1), f32 accumulation in VMEM scratch.
# ---------------------------------------------------------------------------
def _agg_kernel(adj_ref, x_ref, b_ref, out_ref, acc_ref):
    k = pl.program_id(1)

    @pl.when(k == 0)
    def _():
        acc_ref[...] = jnp.zeros_like(acc_ref)

    a = adj_ref[...].astype(jnp.float32)     # bf16 0/1 -> exact f32
    x = x_ref[...].astype(jnp.float32)
    acc_ref[...] += jnp.dot(a, x, preferred_element_type=jnp.float32)

    @pl.when(k == pl.num_programs(1) - 1)
    def _():
        out_ref[...] = (acc_ref[...] + b_ref[...]).astype(out_ref.dtype)


def _aggregate(adj_bf16, x, bias_row, out_dtype):
    n_pad = adj_bf16.shape[0]
    f_pad = x.shape[1]
    grid = (n_pad // _ROW_TILE, n_pad // _K_TILE)
    return pl.pallas_call(
        _agg_kernel,
        out_shape=jax.ShapeDtypeStruct((n_pad, f_pad), out_dtype),
        grid=grid,
        in_specs=[
            pl.BlockSpec((_ROW_TILE, _K_TILE), lambda i, k: (i, k)),   # A tile
            pl.BlockSpec((_K_TILE, f_pad), lambda i, k: (k, 0)),       # X tile
            pl.BlockSpec((1, f_pad), lambda i, k: (0, 0)),             # bias (resident)
        ],
        out_specs=pl.BlockSpec((_ROW_TILE, f_pad), lambda i, k: (i, 0)),
        scratch_shapes=[pltpu.VMEM((_ROW_TILE, f_pad), jnp.float32)],
        compiler_params=pltpu.CompilerParams(
            dimension_semantics=("parallel", "arbitrary"),
        ),
    )(adj_bf16, x, bias_row)


# ---------------------------------------------------------------------------
# Kernel 2: dense projection   out = X @ W_t (+ b), row-tiled, W_t resident.
# ---------------------------------------------------------------------------
def _proj_kernel(x_ref, w_ref, b_ref, out_ref):
    out = jnp.dot(x_ref[...], w_ref[...], preferred_element_type=jnp.float32)
    out_ref[...] = (out + b_ref[...]).astype(out_ref.dtype)


def _project(x, w_t, bias_row, out_dtype):
    n_pad, if_pad = x.shape
    of_pad = w_t.shape[1]
    grid = (n_pad // _ROW_TILE,)
    return pl.pallas_call(
        _proj_kernel,
        out_shape=jax.ShapeDtypeStruct((n_pad, of_pad), out_dtype),
        grid=grid,
        in_specs=[
            pl.BlockSpec((_ROW_TILE, if_pad), lambda i: (i, 0)),
            pl.BlockSpec((if_pad, of_pad), lambda i: (0, 0)),   # W_t resident
            pl.BlockSpec((1, of_pad), lambda i: (0, 0)),        # bias resident
        ],
        out_specs=pl.BlockSpec((_ROW_TILE, of_pad), lambda i: (i, 0)),
        compiler_params=pltpu.CompilerParams(
            dimension_semantics=("parallel",),
        ),
    )(x, w_t, bias_row)


# ---------------------------------------------------------------------------
# GCNLayer.forward
# ---------------------------------------------------------------------------
def gcn_layer(adj, feature, weight, bias):
    """adj: (N, N) with adj[dst, src]=1 per edge; feature: (N, in_feats);
    weight: (out_feats, in_feats); bias: (out_feats,). Returns (N, out_feats)."""
    n, in_feats = feature.shape
    out_feats = weight.shape[0]
    out_dtype = feature.dtype

    n_pad = _round_up(n, _NODE_PAD)
    if_pad = _round_up(in_feats, _LANE)
    of_pad = _round_up(out_feats, _LANE)

    # Zero-pad to lane-dense / tile-divisible shapes (zeros are inert for both
    # the sum-aggregation and the matmul). Adjacency goes to bf16 (exact 0/1).
    adj_p = jnp.zeros((n_pad, n_pad), jnp.bfloat16).at[:n, :n].set(
        adj.astype(jnp.bfloat16))
    feat_p = jnp.zeros((n_pad, if_pad), feature.dtype).at[:n, :in_feats].set(feature)
    w_t_p = jnp.zeros((if_pad, of_pad), jnp.float32).at[:in_feats, :out_feats].set(
        weight.astype(jnp.float32).T)
    bias_p = jnp.zeros((1, of_pad), jnp.float32).at[0, :out_feats].set(
        bias.astype(jnp.float32))

    if out_feats <= in_feats:
        # Reordered algebra: out = A @ (H @ W.T) + b -- contract the N^2
        # matmul over the smaller (output) feature dimension.
        zero_b = jnp.zeros((1, of_pad), jnp.float32)
        hw = _project(feat_p, w_t_p, zero_b, jnp.float32)
        out_p = _aggregate(adj_p, hw, bias_p, out_dtype)
    else:
        # out = (A @ H) @ W.T + b
        zero_b = jnp.zeros((1, if_pad), jnp.float32)
        agg = _aggregate(adj_p, feat_p, zero_b, jnp.float32)
        out_p = _project(agg, w_t_p, bias_p, out_dtype)

    return out_p[:n, :out_feats]


if __name__ == "__main__":
    key = jax.random.PRNGKey(0)

    def run_case(case_key, n, in_feats, out_feats):
        k_feat, k_adj, k_w, k_b = jax.random.split(case_key, 4)
        feature = jax.random.normal(k_feat, (n, in_feats), dtype=jnp.float32)
        adj = (jax.random.uniform(k_adj, (n, n)) < 0.3).astype(jnp.float32)
        bound = 1.0 / jnp.sqrt(jnp.float32(in_feats))
        weight = jax.random.uniform(
            k_w, (out_feats, in_feats), minval=-bound, maxval=bound,
            dtype=jnp.float32)
        bias = jax.random.uniform(
            k_b, (out_feats,), minval=-bound, maxval=bound, dtype=jnp.float32)

        out = jax.block_until_ready(gcn_layer(adj, feature, weight, bias))
        ref = (adj @ feature) @ weight.T + bias
        assert out.shape == (n, out_feats)
        assert jnp.allclose(out, ref, atol=1e-4, rtol=1e-4), float(
            jnp.max(jnp.abs(out - ref)))

    k1, k2 = jax.random.split(key)
    # out_feats > in_feats  -> aggregate-then-project path
    run_case(k1, 16, 8, 32)
    # out_feats < in_feats  -> project-then-aggregate (reordered) path
    run_case(k2, 24, 48, 16)

    print("KERNEL_OK")
</pallas_src>

<mosaic_0001>
module attributes {stable_mosaic.version = 11 : i64} {
  func.func @_agg_kernel(%arg0: i32, %arg1: i32, %arg2: memref<256x512xbf16, #tpu.memory_space<vmem>>, %arg3: memref<512x128xf32, #tpu.memory_space<vmem>>, %arg4: memref<1x128xf32, #tpu.memory_space<vmem>>, %arg5: memref<256x128xf32, #tpu.memory_space<vmem>>, %arg6: memref<256x128xf32, #tpu.memory_space<vmem>>) attributes {dimension_semantics = [#tpu.dimension_semantics<parallel>, #tpu.dimension_semantics<arbitrary>], iteration_bounds = array<i64: 2, 1>, scalar_prefetch = 0 : i64, scratch_operands = 1 : i64, tpu.core_type = #tpu.core_type<tc>, window_params = [{transform_indices = @transform_0, window_bounds = array<i64: 256, 512>}, {transform_indices = @transform_1, window_bounds = array<i64: 512, 128>}, {pipeline_mode = #tpu.pipeline_mode<synchronous>, transform_indices = @transform_2, window_bounds = array<i64: 1, 128>}, {transform_indices = @transform_3, window_bounds = array<i64: 256, 128>}]} {
    %c0_i32 = arith.constant 0 : i32
    %0 = arith.cmpi eq, %arg1, %c0_i32 : i32
    %1 = arith.extui %0 : i1 to i32
    %c0_i32_0 = arith.constant 0 : i32
    %2 = arith.cmpi ne, %1, %c0_i32_0 : i32
    scf.if %2 {
      %cst_10 = arith.constant 0.000000e+00 : f32
      %13 = vector.broadcast %cst_10 : f32 to vector<256x128xf32>
      %c0_11 = arith.constant 0 : index
      %c0_12 = arith.constant 0 : index
      %14 = vector.load %arg6[%c0_11, %c0_12] : memref<256x128xf32, #tpu.memory_space<vmem>>, vector<256x128xf32>
      tpu.vector_store %arg6[%c0_11, %c0_12], %13 {strides = array<i32>} : memref<256x128xf32, #tpu.memory_space<vmem>>, vector<256x128xf32>,
    } else {
    }
    %c0 = arith.constant 0 : index
    %c0_1 = arith.constant 0 : index
    %3 = vector.load %arg2[%c0, %c0_1] : memref<256x512xbf16, #tpu.memory_space<vmem>>, vector<256x512xbf16>
    %4 = arith.extf %3 : vector<256x512xbf16> to vector<256x512xf32>
    %c0_2 = arith.constant 0 : index
    %c0_3 = arith.constant 0 : index
    %5 = vector.load %arg3[%c0_2, %c0_3] : memref<512x128xf32, #tpu.memory_space<vmem>>, vector<512x128xf32>
    %c0_4 = arith.constant 0 : index
    %c0_5 = arith.constant 0 : index
    %6 = vector.load %arg6[%c0_4, %c0_5] : memref<256x128xf32, #tpu.memory_space<vmem>>, vector<256x128xf32>
    %cst = arith.constant dense<0.000000e+00> : vector<256x128xf32>
    %7 = tpu.matmul %4, %5, %cst {dimension_numbers = #tpu.dot_dimension_numbers<[1], [0], [0], [1], [0, 0, 1, 1], [], []>} : vector<256x512xf32>, vector<512x128xf32>, vector<256x128xf32> -> vector<256x128xf32>
    %8 = arith.addf %6, %7 : vector<256x128xf32>
    %c0_6 = arith.constant 0 : index
    %c0_7 = arith.constant 0 : index
    %9 = vector.load %arg6[%c0_6, %c0_7] : memref<256x128xf32, #tpu.memory_space<vmem>>, vector<256x128xf32>
    tpu.vector_store %arg6[%c0_6, %c0_7], %8 {strides = array<i32>} : memref<256x128xf32, #tpu.memory_space<vmem>>, vector<256x128xf32>,
    %c0_i32_8 = arith.constant 0 : i32
    %10 = arith.cmpi eq, %arg1, %c0_i32_8 : i32
    %11 = arith.extui %10 : i1 to i32
    %c0_i32_9 = arith.constant 0 : i32
    %12 = arith.cmpi ne, %11, %c0_i32_9 : i32
    scf.if %12 {
      %c0_10 = arith.constant 0 : index
      %c0_11 = arith.constant 0 : index
      %13 = vector.load %arg6[%c0_10, %c0_11] : memref<256x128xf32, #tpu.memory_space<vmem>>, vector<256x128xf32>
      %c0_12 = arith.constant 0 : index
      %c0_13 = arith.constant 0 : index
      %14 = vector.load %arg4[%c0_12, %c0_13] : memref<1x128xf32, #tpu.memory_space<vmem>>, vector<1x128xf32>
      %15 = vector.broadcast %14 : vector<1x128xf32> to vector<256x128xf32>
      %16 = arith.addf %13, %15 : vector<256x128xf32>
      %c0_14 = arith.constant 0 : index
      %c0_15 = arith.constant 0 : index
      %17 = vector.load %arg5[%c0_14, %c0_15] : memref<256x128xf32, #tpu.memory_space<vmem>>, vector<256x128xf32>
      tpu.vector_store %arg5[%c0_14, %c0_15], %16 {strides = array<i32>} : memref<256x128xf32, #tpu.memory_space<vmem>>, vector<256x128xf32>,
    } else {
    }
    return
  }
  func.func @transform_0(%arg0: i32, %arg1: i32) -> (i32, i32) {
    %c0_i32 = arith.constant 0 : i32
    return %arg0, %arg1 : i32, i32
  }
  func.func @transform_1(%arg0: i32, %arg1: i32) -> (i32, i32) {
    %c0_i32 = arith.constant 0 : i32
    %c0_i32_0 = arith.constant 0 : i32
    return %arg1, %c0_i32 : i32, i32
  }
  func.func @transform_2(%arg0: i32, %arg1: i32) -> (i32, i32) {
    %c0_i32 = arith.constant 0 : i32
    %c0_i32_0 = arith.constant 0 : i32
    %c0_i32_1 = arith.constant 0 : i32
    return %c0_i32, %c0_i32_0 : i32, i32
  }
  func.func @transform_3(%arg0: i32, %arg1: i32) -> (i32, i32) {
    %c0_i32 = arith.constant 0 : i32
    %c0_i32_0 = arith.constant 0 : i32
    return %arg0, %c0_i32 : i32, i32
  }
}

</mosaic_0001>

<bundles_post_ra>
// kernel: tpu_custom_call.1
= control target key start
LH: loop header
LB: loop body
LE: loop exit
PB: predicated region body
PF: predicated region fallthrough
CT: control target
= control target key end

     0   :  { %8 = vsyncpa [#allocation4], 0  ;;  %s2059_s0 = inlined_call_operand.hbm [shape: bf16[512,512], index: 0, kind: input, shape index: {}]   ;;  %s2060_s1 = inlined_call_operand.hbm [shape: f32[512,128], index: 1, kind: input, shape index: {}]   ;;  %s2061_s2 = inlined_call_operand.vmem [shape: f32[1,128], index: 2, kind: input, shape index: {}]   ;;  %s2062_s3 = inlined_call_operand.hbm [shape: f32[512,128], index: 3, kind: output, shape index: {}]  }
   0x1   :  { %10 = vsyncpa [#allocation4 + $0x1], 0 }
   0x2   :  { %11 = vsyncpa [#allocation7], 0 }
   0x3   :  { %12 = vsyncpa [#allocation5], 0 }
   0x4   :  { %14 = vsyncpa [#allocation5 + $0x1], 0  ;;  %s1661_s12 = smov 0   ;;  %s1663_s13 = smov 0  }
   0x5   :  { %s1665_s14 = smov 0   ;;  %s1667_s15 = smov 0  }
   0x6   :  { %s1669_s16 = smov 0   ;;  %s1671_s17 = smov 0  }
   0x7 LB: > { %s1287_s18 = sadd.s32 4294967295, %s1629_s17   ;;  %s1288_s19 = sadd.s32 4294967294, %s1629_s17   ;;  %s1629_s17 = sphi %s1671_s17, %s20_s17   ;;  %s1625_s16 = sphi %s1669_s16, %s2086_s16   ;;  %s1621_s15 = sphi %s1667_s15, %s2085_s15   ;;  %s1617_s14 = sphi %s1665_s14, %s2084_s14   ;;  %s1613_s13 = sphi %s1663_s13, %s2083_s13   ;;  %s1609_s12 = sphi %s1661_s12, %s2082_s12  }
   0x8   : > { %p54_p0 = scmp.ne.s32.totalorder %s1613_s13, %s1609_s12  ;;  %p1695_p1 = scmp.eq.s32.totalorder %s1287_s18, 0 }
   0x9   : > { %p1699_p2 = scmp.eq.s32.totalorder %s1287_s18, 1  ;;  %p131_p3 = scmp.eq.s32.totalorder %s1288_s19, 1 }
   0xa   : > { %s2067_s20 = scalar_select %p1695_p1, 1, 0 }
   0xb   : > { %s2068_s21 = scalar_select %p1699_p2, 1, 0 }
   0xc   : > { %p1705_p4 = por %p1695_p1, %p54_p0  ;;  %p1289_p5 = scmp.ge.s32.totalorder %s1629_s17, 1 }
   0xd   : > { %p1710_p6 = por %p131_p3, %p54_p0  ;;  %p138_p7 = scmp.lt.s32.totalorder %s1629_s17, 3 }
   0xe   : > { %s2069_s22 = scalar_select %p1705_p4, 1, 0 }
   0xf   : > { %s2070_s23 = scalar_select %p1710_p6, 1, 0 }
  0x10   : > { %p1715_p8 = pnand %p1289_p5, %p138_p7  ;;  %s1631_s25 = smov [#allocation6]  }
  0x11   : > { %s153_s26 = sshll.u32 %s1631_s25, 4  ;;  %s32_s28 = sadd.s32 1, %s1625_s16  ;;  %s154_s26 = int_to_ptr.vmem [resolvable:$true] %s153_s26 }
  0x12   : > { %s2071_s24 = scalar_select %p1715_p8, 1, 0 }
  0x13   : > { %p1413_p9 = pneg %p1715_p8  ;;  %s1485_s4 = scalar_lea.hbm %s2060_s1, 8192 }
  0x14   : > { %p1486_p12 = scmp.ne.s32.totalorder %s2060_s1, %s1485_s4  ;;  %p1492_p5 = scmp.lt.u32.totalorder %s1485_s4, %s2060_s1 }
  0x15   : > { %p1724_p11 = pnand %p1413_p9, %p1695_p1 }
  0x17   : > { %p1487_p13 = pneg %p1724_p11 }
  0x19   : > { %p1488_p0 = pnand %p1487_p13, %p1486_p12 }
  0x1b   : > { %p1489_p3 = pneg %p1488_p0 }
  0x1d   : > { %p1494_p7 = pnand %p1492_p5, %p1489_p3 }
  0x1f   : > { %1497 = shalt.err (!%p1494_p7)
}
  0x20   : > { %s1498_s9 = scalar_lea.vmem %s154_s26, 8192  ;;  %p1506_p1 = scmp.lt.s32.totalorder %s154_s26, %s154_s26 }
  0x21   : > { %p1499_p9 = scmp.ne.s32.totalorder %s154_s26, %s1498_s9  ;;  %p1507_p4 = scmp.lt.s32.totalorder %s1498_s9, %s1498_s9 }
  0x23   : > { %p1501_p10 = pnand %p1499_p9, %p1487_p13  ;;  %p1508_p8 = por %p1507_p4, %p1506_p1 }
  0x25   : > { %p1502_p6 = pneg %p1501_p10 }
  0x27   : > { %p1509_p2 = pnand %p1508_p8, %p1502_p6 }
  0x29   : > { %1512 = shalt.err (!%p1509_p2)
}
  0x2a   : > { %s1632_s10 = smov 128   ;;  %s1633_s11 = smov 8  }
  0x2b   : > { %1416 = dma.hbm_to_vmem [thread:$0]  (!%p1724_p11), %s2060_s1, 8192, %s154_s26, [#allocation7], %s1632_s10, %s1632_s10, %s1633_s11  }
  0x2c   : > { %p34_p1 = scmp.ge.s32.totalorder %s32_s28, 2  ;;  %s41_s25 = sadd.s32 1, %s1617_s14 }
  0x2d   : > { %p48_p2 = scmp.ne.s32.totalorder %s1617_s14, %s1613_s13  ;;  %p49_p4 = scmp.eq.s32.totalorder %s1629_s17, 0 }
  0x2e   : > { %s2088_s28 = smov (%p34_p1, %s32_s28), 0  ;;  %p2074_p8 = scmp.ne.s32.totalorder %s2068_s21, 0 }
  0x2f   : > { %p1751_p6 = por %p49_p4, %p48_p2  ;;  %s36_s27 = ssub.s32 %s1625_s16, %s2088_s28 }
  0x30   : > { %p1757_p10 = por %p2074_p8, %p48_p2  ;;  %p1426_p12 = scmp.lt.s32.totalorder %s1629_s17, 2 }
  0x31   : > { %p39_p11 = scmp.eq.s32.totalorder %s36_s27, 0  ;;  %s170_s26 = sand.u32 1, %s1617_s14  }
  0x32   : > { %s1292_s4 = sshll.u32 %s170_s26, 9  ;;  %s1307_s6 = sshll.u32 %s1625_s16, 13 }
  0x33   : > { %s1766_s5 = scalar_select %p39_p11, %s1617_s14, %s41_s25  }
  0x34   : > { %s1772_s9 = scalar_lea.hbm %s2059_s0, %s1307_s6  ;;  %s174_s21 = scalar_lea.vmem [#allocation3], %s1292_s4 }
  0x35   : > { %s184_s10 = sshll.u32 %s174_s21, 4  ;;  %p1778_p13 = pnand %p1426_p12, %p1751_p6  ;;  %s1774_s10 = int_to_ptr.vmem [resolvable:$true] %s184_s10 }
  0x36   : > { %s1782_s18 = scalar_lea.sflag [#allocation4], %s170_s26  ;;  %s1513_s19 = scalar_lea.hbm %s1772_s9, 8192 }
  0x37   : > { %p1514_p0 = scmp.ne.s32.totalorder %s1772_s9, %s1513_s19  ;;  %p1515_p3 = pneg %p1778_p13 }
  0x38   : > { %s1518_s29 = scalar_lea.hbm %s2059_s0, 16384  ;;  %p1519_p9 = scmp.lt.u32.totalorder %s1772_s9, %s2059_s0 }
  0x39   : > { %p1516_p5 = pnand %p1515_p3, %p1514_p0  ;;  %p1520_p1 = scmp.lt.u32.totalorder %s1518_s29, %s1513_s19 }
  0x3a   : > { %p1522_p4 = scmp.lt.u32.totalorder %s1513_s19, %s1772_s9 }
  0x3b   : > { %p1517_p7 = pneg %p1516_p5  ;;  %p1521_p2 = por %p1520_p1, %p1519_p9 }
  0x3d   : > { %p1523_p6 = por %p1522_p4, %p1521_p2 }
  0x3f   : > { %p1524_p8 = pnand %p1523_p6, %p1517_p7 }
  0x41   : > { %1527 = shalt.err (!%p1524_p8)
}
  0x42   : > { %s1528_s26 = scalar_lea.vmem %s1774_s10, 8192  ;;  %s1634_s7 = smov [#allocation3]  }
  0x43   : > { %p1529_p12 = scmp.ne.s32.totalorder %s1774_s10, %s1528_s26  ;;  %s1533_s8 = sshll.u32 %s1634_s7, 4  ;;  %s1534_s8 = int_to_ptr.vmem [resolvable:$false] %s1533_s8 }
  0x44   : > { %s1535_s21 = scalar_lea.vmem %s1534_s8, 16384  ;;  %p1536_p5 = scmp.lt.s32.totalorder %s1774_s10, %s1534_s8 }
  0x45   : > { %p1531_p11 = pnand %p1529_p12, %p1515_p3  ;;  %p1537_p9 = scmp.lt.s32.totalorder %s1535_s21, %s1528_s26 }
  0x47   : > { %p1532_p0 = pneg %p1531_p11  ;;  %p1538_p1 = por %p1537_p9, %p1536_p5 }
  0x49   : > { %p1539_p2 = pnand %p1538_p1, %p1532_p0 }
  0x4b   : > { %1542 = shalt.err (!%p1539_p2)
}
  0x4c   : > { %s1635_s19 = smov 256   ;;  %s1636_s25 = smov 16  }
  0x4d   : > { %1420 = dma.hbm_to_vmem [thread:$0]  (!%p1778_p13), %s1772_s9, 8192, %s1774_s10, %s1782_s18, %s1635_s19, %s1635_s19, %s1636_s25  }
  0x4e   : > { %p2077_p3 = scmp.ne.s32.totalorder %s2071_s24, 0 }
  0x4f   : > { %s1813_s27 = sand.u32 (!%p2077_p3), 1, %s1613_s13   ;;  %p2078_p7 = scmp.ne.s32.totalorder (!%p2077_p3), %s2069_s22, 0 }
  0x50   : > { %196 = sbr.rel (%p2077_p3) target bundleno = 513 (0x201), region = 32  ;;  %s1297_s29 = sshll.u32 (!%p2077_p3), %s1813_s27, 9 }
  0x51   : > { %s199_s4 = scalar_lea.sflag (!%p2077_p3), [#allocation4], %s1813_s27  ;;  %s1817_s6 = scalar_lea.vmem (!%p2077_p3), [#allocation3], %s1297_s29 }
  0x57   : > { %1596 = dma.done.wait (%p2078_p7), %s199_s4, 8192  }
  0x58   : > { %1598 = vsyncadd (%p2078_p7), %s199_s4, 4294959104  ;;  %p2079_p13 = scmp.ne.s32.totalorder %s2067_s20, 0 }
  0x5a   : > { %1600 = dma.done.wait (%p2079_p13), [#allocation7], 8192  }
  0x5b   : > { %1602 = vsyncadd (%p2079_p13), [#allocation7], 4294959104  ;;  %v1637_v0 = vmov 0.0|0.0   ;;  %v461_v1 = vld [vmem:[#allocation6] sm:$0xff]  ;;  %v462_v2 = vld [vmem:[#allocation6 + $0x8] sm:$0xff]  ;;  %s1299_s20 = sshll.u32 %s1813_s27, 8 }
  0x5c   : > { %1309 = vmatprep.subr.bf16.mxu0 %v1637_v0  ;;  %1357 = vmatprep.subr.bf16.mxu1 %v1637_v0  ;;  %v493_v3 = vld [vmem:[#allocation6 + $0x100] sm:$0xff]  ;;  %v1310_v4 = vpack.c.bf16 %v462_v2, %v461_v1  ;;  %v494_v5 = vld [vmem:[#allocation6 + $0x108] sm:$0xff]  ;;  %v463_v6 = vld [vmem:[#allocation6 + $0x10] sm:$0xff]  ;;  %s1938_s9 = scalar_lea.vmem [#allocation8], %s1299_s20  ;;  %s1308_s10 = sshll.u32 %s1621_s15, 12 }
  0x5d   : > { %v464_v7 = vld [vmem:[#allocation6 + $0x18] sm:$0xff]  ;;  %v1358_v8 = vpack.c.bf16 %v494_v5, %v493_v3  ;;  %v495_v9 = vld [vmem:[#allocation6 + $0x110] sm:$0xff]  ;;  %v465_v13 = vld [vmem:[#allocation6 + $0x20] sm:$0xff]  ;;  %s1191_s11 = sshll.u32 %s1938_s9, 4  ;;  %s2006_s7 = scalar_lea.hbm %s2062_s3, %s1308_s10  ;;  %s2008_s11 = int_to_ptr.vmem [resolvable:$true] %s1191_s11 }
  0x5e   : > { %v496_v10 = vld [vmem:[#allocation6 + $0x118] sm:$0xff]  ;;  %1311 = vmatpush1.bf16.msra.mxu0 %v1310_v4  ;;  %v1313_v11 = vpack.c.bf16 %v464_v7, %v463_v6  ;;  %v466_v14 = vld [vmem:[#allocation6 + $0x28] sm:$0xff]  ;;  %v497_v15 = vld [vmem:[#allocation6 + $0x120] sm:$0xff]  ;;  %s1178_s15 = scalar_lea.sflag [#allocation5], %s1813_s27  ;;  %s1543_s8 = scalar_lea.vmem %s2008_s11, 4096 }
  0x5f   : > { %1359 = vmatpush1.bf16.msra.mxu1 %v1358_v8  ;;  %1312 = vmatprep.subr.bf16.mxu0 %v1637_v0  ;;  %v1361_v12 = vpack.c.bf16 %v496_v10, %v495_v9  ;;  %v498_v16 = vld [vmem:[#allocation6 + $0x128] sm:$0xff]  ;;  %v1316_v17 = vpack.c.bf16 %v466_v14, %v465_v13  ;;  %v467_v19 = vld [vmem:[#allocation6 + $0x30] sm:$0xff]  ;;  %v468_v20 = vld [vmem:[#allocation6 + $0x38] sm:$0xff]  ;;  %p1544_p4 = scmp.ne.s32.totalorder %s2008_s11, %s1543_s8  ;;  %s1638_s21 = smov [#allocation8]  }
  0x60   : > { %1360 = vmatprep.subr.bf16.mxu1 %v1637_v0  ;;  %v1364_v18 = vpack.c.bf16 %v498_v16, %v497_v15  ;;  %v499_v21 = vld [vmem:[#allocation6 + $0x130] sm:$0xff]  ;;  %v500_v22 = vld [vmem:[#allocation6 + $0x138] sm:$0xff]  ;;  %v1319_v23 = vpack.c.bf16 %v468_v20, %v467_v19  ;;  %v469_v25 = vld [vmem:[#allocation6 + $0x40] sm:$0xff]  ;;  %s1547_s19 = sshll.u32 %s1638_s21, 4  ;;  %s1548_s19 = int_to_ptr.vmem [resolvable:$false] %s1547_s19 }
  0x61   : > { %v1367_v24 = vpack.c.bf16 %v500_v22, %v499_v21  ;;  %v470_v26 = vld [vmem:[#allocation6 + $0x48] sm:$0xff]  ;;  %v501_v27 = vld [vmem:[#allocation6 + $0x140] sm:$0xff]  ;;  %v471_v31 = vld [vmem:[#allocation6 + $0x50] sm:$0xff]  ;;  %p1545_p6 = pnand %p1544_p4, %p1757_p10  ;;  %s1549_s25 = scalar_lea.vmem %s1548_s19, 8192 }
  0x62   : > { %1314 = vmatpush1.bf16.msra.mxu0 %v1313_v11  ;;  %v502_v28 = vld [vmem:[#allocation6 + $0x148] sm:$0xff]  ;;  %v1322_v29 = vpack.c.bf16 %v470_v26, %v469_v25  ;;  %v472_v32 = vld [vmem:[#allocation6 + $0x58] sm:$0xff]  ;;  %v503_v33 = vld [vmem:[#allocation6 + $0x150] sm:$0xff]  ;;  %p1550_p12 = scmp.lt.s32.totalorder %s2008_s11, %s1548_s19  ;;  %p1551_p11 = scmp.lt.s32.totalorder %s1549_s25, %s1543_s8 }
  0x63   : > { %1362 = vmatpush1.bf16.msra.mxu1 %v1361_v12  ;;  %1315 = vmatprep.subr.bf16.mxu0 %v1637_v0  ;;  %v1370_v30 = vpack.c.bf16 %v502_v28, %v501_v27  ;;  %v504_v34 = vld [vmem:[#allocation6 + $0x158] sm:$0xff]  ;;  %v1325_v35 = vpack.c.bf16 %v472_v32, %v471_v31  ;;  %v473_v37 = vld [vmem:[#allocation6 + $0x60] sm:$0xff]  ;;  %v474_v38 = vld [vmem:[#allocation6 + $0x68] sm:$0xff]  ;;  %p1546_p8 = pneg %p1545_p6 }
  0x64   : > { %1363 = vmatprep.subr.bf16.mxu1 %v1637_v0  ;;  %v1373_v36 = vpack.c.bf16 %v504_v34, %v503_v33  ;;  %v505_v39 = vld [vmem:[#allocation6 + $0x160] sm:$0xff]  ;;  %v506_v40 = vld [vmem:[#allocation6 + $0x168] sm:$0xff]  ;;  %v1328_v44 = vpack.c.bf16 %v474_v38, %v473_v37  ;;  %v475_v47 = vld [vmem:[#allocation6 + $0x70] sm:$0xff]  ;;  %p1552_p0 = por %p1551_p11, %p1550_p12 }
  0x65   : > { %v1840_v41 = vld [vmem:[%s1817_s6] sm:$0xff]  ;;  %v1843_v42 = vld [vmem:[%s1817_s6 + $0x8] sm:$0xff]  ;;  %v1376_v46 = vpack.c.bf16 %v506_v40, %v505_v39  ;;  %v476_v48 = vld [vmem:[#allocation6 + $0x78] sm:$0xff] }
  0x66   : > { %1317 = vmatpush1.bf16.msra.mxu0 %v1316_v17  ;;  %v334_v43 = vunpack.c.h.bf16 %v1840_v41  ;;  %v336_v45 = vunpack.c.h.bf16 %v1843_v42  ;;  %v507_v49 = vld [vmem:[#allocation6 + $0x170] sm:$0xff]  ;;  %v508_v50 = vld [vmem:[#allocation6 + $0x178] sm:$0xff]  ;;  %v1331_v51 = vpack.c.bf16 %v476_v48, %v475_v47  ;;  %v477_v53 = vld [vmem:[#allocation6 + $0x80] sm:$0xff]  ;;  %v333_v40 = vunpack.c.l.bf16 %v1840_v41  ;;  %p1553_p5 = pnand %p1552_p0, %p1546_p8 }
  0x67   : > { %1365 = vmatpush1.bf16.msra.mxu1 %v1364_v18  ;;  %1318 = vmatprep.subr.bf16.mxu0 %v1637_v0  ;;  %v1379_v52 = vpack.c.bf16 %v508_v50, %v507_v49  ;;  %v478_v54 = vld [vmem:[#allocation6 + $0x88] sm:$0xff]  ;;  %v509_v55 = vld [vmem:[#allocation6 + $0x180] sm:$0xff]  ;;  %v479_v59 = vld [vmem:[#allocation6 + $0x90] sm:$0xff] }
  0x68   : > { %1366 = vmatprep.subr.bf16.mxu1 %v1637_v0  ;;  %621 = vmatprep.mubr.f32.mxu0 %v334_v43  ;;  %v510_v56 = vld [vmem:[#allocation6 + $0x188] sm:$0xff]  ;;  %v1334_v57 = vpack.c.bf16 %v478_v54, %v477_v53  ;;  %v480_v60 = vld [vmem:[#allocation6 + $0x98] sm:$0xff]  ;;  %v511_v61 = vld [vmem:[#allocation6 + $0x190] sm:$0xff]  ;;  %v335_v43 = vunpack.c.l.bf16 %v1843_v42 }
  0x69   : > { %846 = vmatprep.mubr.f32.mxu1 %v336_v45  ;;  %v1382_v58 = vpack.c.bf16 %v510_v56, %v509_v55  ;;  %v512_v62 = vld [vmem:[#allocation6 + $0x198] sm:$0xff]  ;;  %v1337_v63 = vpack.c.bf16 %v480_v60, %v479_v59  ;;  %v481_v2 = vld [vmem:[#allocation6 + $0xa0] sm:$0xff]  ;;  %v482_v3 = vld [vmem:[#allocation6 + $0xa8] sm:$0xff] }
  0x6a   : > { %1320 = vmatpush1.bf16.msra.mxu0 %v1319_v23  ;;  %v1385_v1 = vpack.c.bf16 %v512_v62, %v511_v61  ;;  %v513_v4 = vld [vmem:[#allocation6 + $0x1a0] sm:$0xff]  ;;  %v514_v5 = vld [vmem:[#allocation6 + $0x1a8] sm:$0xff]  ;;  %v1340_v6 = vpack.c.bf16 %v482_v3, %v481_v2  ;;  %v483_v8 = vld [vmem:[#allocation6 + $0xb0] sm:$0xff] }
  0x6b   : > { %1368 = vmatpush1.bf16.msra.mxu1 %v1367_v24  ;;  %1321 = vmatprep.subr.bf16.mxu0 %v1637_v0  ;;  %v1388_v7 = vpack.c.bf16 %v514_v5, %v513_v4  ;;  %v484_v9 = vld [vmem:[#allocation6 + $0xb8] sm:$0xff]  ;;  %v515_v10 = vld [vmem:[#allocation6 + $0x1b0] sm:$0xff]  ;;  %v485_v14 = vld [vmem:[#allocation6 + $0xc0] sm:$0xff] }
  0x6c   : > { %1369 = vmatprep.subr.bf16.mxu1 %v1637_v0  ;;  %v516_v11 = vld [vmem:[#allocation6 + $0x1b8] sm:$0xff]  ;;  %v1343_v12 = vpack.c.bf16 %v484_v9, %v483_v8  ;;  %v486_v15 = vld [vmem:[#allocation6 + $0xc8] sm:$0xff]  ;;  %v517_v16 = vld [vmem:[#allocation6 + $0x1c0] sm:$0xff] }
  0x6d   : > { %v1391_v13 = vpack.c.bf16 %v516_v11, %v515_v10  ;;  %v518_v17 = vld [vmem:[#allocation6 + $0x1c8] sm:$0xff]  ;;  %v1346_v18 = vpack.c.bf16 %v486_v15, %v485_v14  ;;  %v487_v20 = vld [vmem:[#allocation6 + $0xd0] sm:$0xff]  ;;  %v488_v21 = vld [vmem:[#allocation6 + $0xd8] sm:$0xff] }
  0x6e   : > { %1323 = vmatpush1.bf16.msra.mxu0 %v1322_v29  ;;  %v1394_v19 = vpack.c.bf16 %v518_v17, %v517_v16  ;;  %v519_v22 = vld [vmem:[#allocation6 + $0x1d0] sm:$0xff]  ;;  %v520_v23 = vld [vmem:[#allocation6 + $0x1d8] sm:$0xff]  ;;  %v1349_v24 = vpack.c.bf16 %v488_v21, %v487_v20  ;;  %v489_v26 = vld [vmem:[#allocation6 + $0xe0] sm:$0xff] }
  0x6f   : > { %1371 = vmatpush1.bf16.msra.mxu1 %v1370_v30  ;;  %1324 = vmatprep.subr.bf16.mxu0 %v1637_v0  ;;  %v1397_v25 = vpack.c.bf16 %v520_v23, %v519_v22  ;;  %v490_v27 = vld [vmem:[#allocation6 + $0xe8] sm:$0xff]  ;;  %v521_v28 = vld [vmem:[#allocation6 + $0x1e0] sm:$0xff]  ;;  %v491_v32 = vld [vmem:[#allocation6 + $0xf0] sm:$0xff] }
  0x70   : > { %1372 = vmatprep.subr.bf16.mxu1 %v1637_v0  ;;  %v522_v29 = vld [vmem:[#allocation6 + $0x1e8] sm:$0xff]  ;;  %v1352_v30 = vpack.c.bf16 %v490_v27, %v489_v26  ;;  %v492_v33 = vld [vmem:[#allocation6 + $0xf8] sm:$0xff]  ;;  %v523_v34 = vld [vmem:[#allocation6 + $0x1f0] sm:$0xff] }
  0x71   : > { %v1400_v31 = vpack.c.bf16 %v522_v29, %v521_v28  ;;  %v271_v38 = vld [vmem:[%s1817_s6 + $0x10] sm:$0xff]  ;;  %v272_v39 = vld [vmem:[%s1817_s6 + $0x18] sm:$0xff]  ;;  %v274_v47 = vld [vmem:[%s1817_s6 + $0x28] sm:$0xff] }
  0x72   : > { %1326 = vmatpush1.bf16.msra.mxu0 %v1325_v35  ;;  %v524_v35 = vld [vmem:[#allocation6 + $0x1f8] sm:$0xff]  ;;  %v340_v45 = vunpack.c.h.bf16 %v272_v39  ;;  %v337_v48 = vunpack.c.l.bf16 %v271_v38  ;;  %v344_v41 = vunpack.c.h.bf16 %v274_v47  ;;  %v275_v50 = vld [vmem:[%s1817_s6 + $0x30] sm:$0xff]  ;;  %v343_v42 = vunpack.c.l.bf16 %v274_v47  ;;  %v277_v55 = vld [vmem:[%s1817_s6 + $0x40] sm:$0xff] }
  0x73   : > { %1374 = vmatpush1.bf16.msra.mxu1 %v1373_v36  ;;  %1327 = vmatprep.subr.bf16.mxu0 %v1637_v0  ;;  %v1355_v36 = vpack.c.bf16 %v492_v33, %v491_v32  ;;  %v1403_v37 = vpack.c.bf16 %v524_v35, %v523_v34  ;;  %v346_v53 = vunpack.c.h.bf16 %v275_v50  ;;  %v278_v56 = vld [vmem:[%s1817_s6 + $0x48] sm:$0xff]  ;;  %v350_v59 = vunpack.c.h.bf16 %v277_v55  ;;  %v279_v61 = vld [vmem:[%s1817_s6 + $0x50] sm:$0xff]  ;;  %v280_v62 = vld [vmem:[%s1817_s6 + $0x58] sm:$0xff] }
  0x74   : > { %1375 = vmatprep.subr.bf16.mxu1 %v1637_v0  ;;  %v352_v60 = vunpack.c.h.bf16 %v278_v56  ;;  %v354_v2 = vunpack.c.h.bf16 %v279_v61  ;;  %v356_v3 = vunpack.c.h.bf16 %v280_v62  ;;  %v281_v4 = vld [vmem:[%s1817_s6 + $0x60] sm:$0xff]  ;;  %v282_v5 = vld [vmem:[%s1817_s6 + $0x68] sm:$0xff]  ;;  %v283_v10 = vld [vmem:[%s1817_s6 + $0x70] sm:$0xff] }
  0x75   : > { %v358_v8 = vunpack.c.h.bf16 %v281_v4  ;;  %v360_v9 = vunpack.c.h.bf16 %v282_v5  ;;  %v284_v11 = vld [vmem:[%s1817_s6 + $0x78] sm:$0xff]  ;;  %v362_v14 = vunpack.c.h.bf16 %v283_v10  ;;  %v285_v16 = vld [vmem:[%s1817_s6 + $0x80] sm:$0xff]  ;;  %v286_v17 = vld [vmem:[%s1817_s6 + $0x88] sm:$0xff] }
  0x76   : > { %1329 = vmatpush1.bf16.msra.mxu0 %v1328_v44  ;;  %v338_v44 = vunpack.c.h.bf16 %v271_v38  ;;  %v364_v15 = vunpack.c.h.bf16 %v284_v11  ;;  %v366_v20 = vunpack.c.h.bf16 %v285_v16  ;;  %v368_v21 = vunpack.c.h.bf16 %v286_v17  ;;  %v287_v22 = vld [vmem:[%s1817_s6 + $0x90] sm:$0xff]  ;;  %v288_v23 = vld [vmem:[%s1817_s6 + $0x98] sm:$0xff]  ;;  %v289_v28 = vld [vmem:[%s1817_s6 + $0xa0] sm:$0xff] }
  0x77   : > { %1377 = vmatpush1.bf16.msra.mxu1 %v1376_v46  ;;  %1330 = vmatprep.subr.bf16.mxu0 %v1637_v0  ;;  %v273_v46 = vld [vmem:[%s1817_s6 + $0x20] sm:$0xff]  ;;  %v370_v26 = vunpack.c.h.bf16 %v287_v22  ;;  %v372_v27 = vunpack.c.h.bf16 %v288_v23  ;;  %v290_v29 = vld [vmem:[%s1817_s6 + $0xa8] sm:$0xff]  ;;  %v374_v32 = vunpack.c.h.bf16 %v289_v28  ;;  %v291_v34 = vld [vmem:[%s1817_s6 + $0xb0] sm:$0xff] }
  0x78   : > { %1378 = vmatprep.subr.bf16.mxu1 %v1637_v0  ;;  %v342_v49 = vunpack.c.h.bf16 %v273_v46  ;;  %v376_v33 = vunpack.c.h.bf16 %v290_v29  ;;  %v292_v35 = vld [vmem:[%s1817_s6 + $0xb8] sm:$0xff]  ;;  %v378_v38 = vunpack.c.h.bf16 %v291_v34 }
  0x7a   : > { %1332 = vmatpush1.bf16.msra.mxu0 %v1331_v51  ;;  %v276_v51 = vld [vmem:[%s1817_s6 + $0x38] sm:$0xff] }
  0x7b   : > { %1380 = vmatpush1.bf16.msra.mxu1 %v1379_v52  ;;  %1333 = vmatprep.subr.bf16.mxu0 %v1637_v0  ;;  %v341_v52 = vunpack.c.l.bf16 %v273_v46  ;;  %v348_v54 = vunpack.c.h.bf16 %v276_v51 }
  0x7c   : > { %1381 = vmatprep.subr.bf16.mxu1 %v1637_v0 }
  0x7e   : > { %1335 = vmatpush1.bf16.msra.mxu0 %v1334_v57  ;;  %v345_v57 = vunpack.c.l.bf16 %v275_v50 }
  0x7f   : > { %1383 = vmatpush1.bf16.msra.mxu1 %v1382_v58  ;;  %1336 = vmatprep.subr.bf16.mxu0 %v1637_v0  ;;  %v347_v58 = vunpack.c.l.bf16 %v276_v51 }
  0x80   : > { %1384 = vmatprep.subr.bf16.mxu1 %v1637_v0 }
  0x82   : > { %1338 = vmatpush1.bf16.msra.mxu0 %v1337_v63  ;;  %v349_v63 = vunpack.c.l.bf16 %v277_v55 }
  0x83   : > { %1386 = vmatpush1.bf16.msra.mxu1 %v1385_v1  ;;  %1339 = vmatprep.subr.bf16.mxu0 %v1637_v0  ;;  %v351_v1 = vunpack.c.l.bf16 %v278_v56 }
  0x84   : > { %1387 = vmatprep.subr.bf16.mxu1 %v1637_v0 }
  0x86   : > { %1341 = vmatpush1.bf16.msra.mxu0 %v1340_v6  ;;  %v353_v6 = vunpack.c.l.bf16 %v279_v61 }
  0x87   : > { %1389 = vmatpush1.bf16.msra.mxu1 %v1388_v7  ;;  %1342 = vmatprep.subr.bf16.mxu0 %v1637_v0  ;;  %v355_v7 = vunpack.c.l.bf16 %v280_v62 }
  0x88   : > { %1390 = vmatprep.subr.bf16.mxu1 %v1637_v0 }
  0x8a   : > { %1344 = vmatpush1.bf16.msra.mxu0 %v1343_v12  ;;  %v357_v12 = vunpack.c.l.bf16 %v281_v4 }
  0x8b   : > { %1392 = vmatpush1.bf16.msra.mxu1 %v1391_v13  ;;  %1345 = vmatprep.subr.bf16.mxu0 %v1637_v0  ;;  %v359_v13 = vunpack.c.l.bf16 %v282_v5 }
  0x8c   : > { %1393 = vmatprep.subr.bf16.mxu1 %v1637_v0 }
  0x8e   : > { %1347 = vmatpush1.bf16.msra.mxu0 %v1346_v18  ;;  %v361_v18 = vunpack.c.l.bf16 %v283_v10 }
  0x8f   : > { %1395 = vmatpush1.bf16.msra.mxu1 %v1394_v19  ;;  %1348 = vmatprep.subr.bf16.mxu0 %v1637_v0  ;;  %v363_v19 = vunpack.c.l.bf16 %v284_v11 }
  0x90   : > { %1396 = vmatprep.subr.bf16.mxu1 %v1637_v0 }
  0x92   : > { %1350 = vmatpush1.bf16.msra.mxu0 %v1349_v24  ;;  %v365_v24 = vunpack.c.l.bf16 %v285_v16 }
  0x93   : > { %1398 = vmatpush1.bf16.msra.mxu1 %v1397_v25  ;;  %1351 = vmatprep.subr.bf16.mxu0 %v1637_v0  ;;  %v367_v25 = vunpack.c.l.bf16 %v286_v17 }
  0x94   : > { %1399 = vmatprep.subr.bf16.mxu1 %v1637_v0 }
  0x96   : > { %1353 = vmatpush1.bf16.msra.mxu0 %v1352_v30  ;;  %v369_v30 = vunpack.c.l.bf16 %v287_v22 }
  0x97   : > { %1401 = vmatpush1.bf16.msra.mxu1 %v1400_v31  ;;  %1354 = vmatprep.subr.bf16.mxu0 %v1637_v0  ;;  %v371_v31 = vunpack.c.l.bf16 %v288_v23 }
  0x98   : > { %1402 = vmatprep.subr.bf16.mxu1 %v1637_v0  ;;  %v339_v0 = vunpack.c.l.bf16 %v272_v39  ;;  %v380_v39 = vunpack.c.h.bf16 %v292_v35 }
  0x9a   : > { %1356 = vmatpush1.bf16.msra.mxu0 %v1355_v36  ;;  %v373_v36 = vunpack.c.l.bf16 %v289_v28 }
  0x9b   : > { %1404 = vmatpush1.bf16.msra.mxu1 %v1403_v37  ;;  %v375_v37 = vunpack.c.l.bf16 %v290_v29 }
  0x9d   : > { %622 = vmatmul.mubr.f32.vlgmr.msra.gmra.mrb[0].mxu0 %v333_v40  ;;  %v293_v40 = vld [vmem:[%s1817_s6 + $0xc0] sm:$0xff] }
  0x9e   : > { %847 = vmatmul.mubr.f32.vlgmr.msra.gmra.mrb[0].mxu1 %v335_v43  ;;  %626 = vmatprep.mubr.f32.mxu0 %v338_v44  ;;  %v294_v43 = vld [vmem:[%s1817_s6 + $0xc8] sm:$0xff]  ;;  %v377_v44 = vunpack.c.l.bf16 %v291_v34  ;;  %v382_v46 = vunpack.c.h.bf16 %v293_v40 }
  0x9f   : > { %851 = vmatprep.mubr.f32.mxu1 %v340_v45  ;;  %v379_v45 = vunpack.c.l.bf16 %v292_v35  ;;  %v384_v47 = vunpack.c.h.bf16 %v294_v43 }
  0xa1   : > { %627 = vmatmul.mubr.f32.gmra.mrb[2].mxu0 %v337_v48  ;;  %v295_v48 = vld [vmem:[%s1817_s6 + $0xd0] sm:$0xff] }
  0xa2   : > { %852 = vmatmul.mubr.f32.gmra.mrb[2].mxu1 %v339_v0  ;;  %631 = vmatprep.mubr.f32.mxu0 %v342_v49  ;;  %v296_v0 = vld [vmem:[%s1817_s6 + $0xd8] sm:$0xff]  ;;  %v381_v49 = vunpack.c.l.bf16 %v293_v40  ;;  %v386_v50 = vunpack.c.h.bf16 %v295_v48 }
  0xa3   : > { %856 = vmatprep.mubr.f32.mxu1 %v344_v41  ;;  %v383_v41 = vunpack.c.l.bf16 %v294_v43  ;;  %v388_v51 = vunpack.c.h.bf16 %v296_v0 }
  0xa5   : > { %632 = vmatmul.mubr.f32.gmra.mrb[4].mxu0 %v341_v52  ;;  %v297_v52 = vld [vmem:[%s1817_s6 + $0xe0] sm:$0xff] }
  0xa6   : > { %857 = vmatmul.mubr.f32.gmra.mrb[4].mxu1 %v343_v42  ;;  %636 = vmatprep.mubr.f32.mxu0 %v346_v53  ;;  %v298_v42 = vld [vmem:[%s1817_s6 + $0xe8] sm:$0xff]  ;;  %v385_v53 = vunpack.c.l.bf16 %v295_v48  ;;  %v390_v55 = vunpack.c.h.bf16 %v297_v52 }
  0xa7   : > { %861 = vmatprep.mubr.f32.mxu1 %v348_v54  ;;  %v387_v54 = vunpack.c.l.bf16 %v296_v0  ;;  %v392_v56 = vunpack.c.h.bf16 %v298_v42 }
  0xa9   : > { %637 = vmatmul.mubr.f32.gmra.mrb[6].mxu0 %v345_v57  ;;  %v299_v57 = vld [vmem:[%s1817_s6 + $0xf0] sm:$0xff] }
  0xaa   : > { %862 = vmatmul.mubr.f32.gmra.mrb[6].mxu1 %v347_v58  ;;  %641 = vmatprep.mubr.f32.mxu0 %v350_v59  ;;  %v300_v58 = vld [vmem:[%s1817_s6 + $0xf8] sm:$0xff]  ;;  %v389_v59 = vunpack.c.l.bf16 %v297_v52  ;;  %v394_v61 = vunpack.c.h.bf16 %v299_v57 }
  0xab   : > { %866 = vmatprep.mubr.f32.mxu1 %v352_v60  ;;  %v391_v60 = vunpack.c.l.bf16 %v298_v42  ;;  %v396_v62 = vunpack.c.h.bf16 %v300_v58 }
  0xad   : > { %642 = vmatmul.mubr.f32.gmra.mrb[8].mxu0 %v349_v63  ;;  %v301_v63 = vld [vmem:[%s1817_s6 + $0x100] sm:$0xff] }
  0xae   : > { %867 = vmatmul.mubr.f32.gmra.mrb[8].mxu1 %v351_v1  ;;  %646 = vmatprep.mubr.f32.mxu0 %v354_v2  ;;  %v302_v1 = vld [vmem:[%s1817_s6 + $0x108] sm:$0xff]  ;;  %v393_v2 = vunpack.c.l.bf16 %v299_v57  ;;  %v398_v4 = vunpack.c.h.bf16 %v301_v63 }
  0xaf   : > { %871 = vmatprep.mubr.f32.mxu1 %v356_v3  ;;  %v395_v3 = vunpack.c.l.bf16 %v300_v58  ;;  %v400_v5 = vunpack.c.h.bf16 %v302_v1 }
  0xb1   : > { %647 = vmatmul.mubr.f32.gmra.mrb[10].mxu0 %v353_v6  ;;  %v303_v6 = vld [vmem:[%s1817_s6 + $0x110] sm:$0xff] }
  0xb2   : > { %872 = vmatmul.mubr.f32.gmra.mrb[10].mxu1 %v355_v7  ;;  %651 = vmatprep.mubr.f32.mxu0 %v358_v8  ;;  %v304_v7 = vld [vmem:[%s1817_s6 + $0x118] sm:$0xff]  ;;  %v397_v8 = vunpack.c.l.bf16 %v301_v63  ;;  %v402_v10 = vunpack.c.h.bf16 %v303_v6 }
  0xb3   : > { %876 = vmatprep.mubr.f32.mxu1 %v360_v9  ;;  %v399_v9 = vunpack.c.l.bf16 %v302_v1  ;;  %v404_v11 = vunpack.c.h.bf16 %v304_v7 }
  0xb5   : > { %652 = vmatmul.mubr.f32.gmra.mrb[12].mxu0 %v357_v12  ;;  %v305_v12 = vld [vmem:[%s1817_s6 + $0x120] sm:$0xff] }
  0xb6   : > { %877 = vmatmul.mubr.f32.gmra.mrb[12].mxu1 %v359_v13  ;;  %656 = vmatprep.mubr.f32.mxu0 %v362_v14  ;;  %v306_v13 = vld [vmem:[%s1817_s6 + $0x128] sm:$0xff]  ;;  %v401_v14 = vunpack.c.l.bf16 %v303_v6  ;;  %v406_v16 = vunpack.c.h.bf16 %v305_v12 }
  0xb7   : > { %881 = vmatprep.mubr.f32.mxu1 %v364_v15  ;;  %v403_v15 = vunpack.c.l.bf16 %v304_v7  ;;  %v408_v17 = vunpack.c.h.bf16 %v306_v13 }
  0xb9   : > { %657 = vmatmul.mubr.f32.gmra.mrb[14].mxu0 %v361_v18  ;;  %v307_v18 = vld [vmem:[%s1817_s6 + $0x130] sm:$0xff] }
  0xba   : > { %882 = vmatmul.mubr.f32.gmra.mrb[14].mxu1 %v363_v19  ;;  %661 = vmatprep.mubr.f32.mxu0 %v366_v20  ;;  %v308_v19 = vld [vmem:[%s1817_s6 + $0x138] sm:$0xff]  ;;  %v405_v20 = vunpack.c.l.bf16 %v305_v12  ;;  %v410_v22 = vunpack.c.h.bf16 %v307_v18 }
  0xbb   : > { %886 = vmatprep.mubr.f32.mxu1 %v368_v21  ;;  %v407_v21 = vunpack.c.l.bf16 %v306_v13  ;;  %v412_v23 = vunpack.c.h.bf16 %v308_v19 }
  0xbd   : > { %662 = vmatmul.mubr.f32.gmra.mrb[16].mxu0 %v365_v24  ;;  %v309_v24 = vld [vmem:[%s1817_s6 + $0x140] sm:$0xff] }
  0xbe   : > { %887 = vmatmul.mubr.f32.gmra.mrb[16].mxu1 %v367_v25  ;;  %666 = vmatprep.mubr.f32.mxu0 %v370_v26  ;;  %v310_v25 = vld [vmem:[%s1817_s6 + $0x148] sm:$0xff]  ;;  %v409_v26 = vunpack.c.l.bf16 %v307_v18  ;;  %v414_v28 = vunpack.c.h.bf16 %v309_v24 }
  0xbf   : > { %891 = vmatprep.mubr.f32.mxu1 %v372_v27  ;;  %v411_v27 = vunpack.c.l.bf16 %v308_v19  ;;  %v416_v29 = vunpack.c.h.bf16 %v310_v25 }
  0xc1   : > { %667 = vmatmul.mubr.f32.gmra.mrb[18].mxu0 %v369_v30  ;;  %v311_v30 = vld [vmem:[%s1817_s6 + $0x150] sm:$0xff] }
  0xc2   : > { %892 = vmatmul.mubr.f32.gmra.mrb[18].mxu1 %v371_v31  ;;  %671 = vmatprep.mubr.f32.mxu0 %v374_v32  ;;  %v312_v31 = vld [vmem:[%s1817_s6 + $0x158] sm:$0xff]  ;;  %v413_v32 = vunpack.c.l.bf16 %v309_v24  ;;  %v418_v34 = vunpack.c.h.bf16 %v311_v30 }
  0xc3   : > { %896 = vmatprep.mubr.f32.mxu1 %v376_v33  ;;  %v415_v33 = vunpack.c.l.bf16 %v310_v25  ;;  %v420_v35 = vunpack.c.h.bf16 %v312_v31 }
  0xc5   : > { %672 = vmatmul.mubr.f32.gmra.mrb[20].mxu0 %v373_v36  ;;  %v313_v36 = vld [vmem:[%s1817_s6 + $0x160] sm:$0xff] }
  0xc6   : > { %897 = vmatmul.mubr.f32.gmra.mrb[20].mxu1 %v375_v37  ;;  %676 = vmatprep.mubr.f32.mxu0 %v378_v38  ;;  %v314_v37 = vld [vmem:[%s1817_s6 + $0x168] sm:$0xff]  ;;  %v417_v38 = vunpack.c.l.bf16 %v311_v30  ;;  %v422_v40 = vunpack.c.h.bf16 %v313_v36 }
  0xc7   : > { %901 = vmatprep.mubr.f32.mxu1 %v380_v39  ;;  %v419_v39 = vunpack.c.l.bf16 %v312_v31  ;;  %v424_v43 = vunpack.c.h.bf16 %v314_v37 }
  0xc9   : > { %677 = vmatmul.mubr.f32.gmra.mrb[22].mxu0 %v377_v44  ;;  %v315_v44 = vld [vmem:[%s1817_s6 + $0x170] sm:$0xff] }
  0xca   : > { %902 = vmatmul.mubr.f32.gmra.mrb[22].mxu1 %v379_v45  ;;  %681 = vmatprep.mubr.f32.mxu0 %v382_v46  ;;  %v316_v45 = vld [vmem:[%s1817_s6 + $0x178] sm:$0xff]  ;;  %v421_v46 = vunpack.c.l.bf16 %v313_v36  ;;  %v426_v48 = vunpack.c.h.bf16 %v315_v44  ;;  %v1935_v36 = vld [vmem:[%s2061_s2] ss:$0 sm:$0xff] }
  0xcb   : > { %906 = vmatprep.mubr.f32.mxu1 %v384_v47  ;;  %v423_v47 = vunpack.c.l.bf16 %v314_v37  ;;  %v428_v0 = vunpack.c.h.bf16 %v316_v45 }
  0xcd   : > { %682 = vmatmul.mubr.f32.gmra.mrb[24].mxu0 %v381_v49  ;;  %v317_v49 = vld [vmem:[%s1817_s6 + $0x180] sm:$0xff] }
  0xce   : > { %907 = vmatmul.mubr.f32.gmra.mrb[24].mxu1 %v383_v41  ;;  %686 = vmatprep.mubr.f32.mxu0 %v386_v50  ;;  %v318_v41 = vld [vmem:[%s1817_s6 + $0x188] sm:$0xff]  ;;  %v425_v50 = vunpack.c.l.bf16 %v315_v44  ;;  %v430_v52 = vunpack.c.h.bf16 %v317_v49 }
  0xcf   : > { %911 = vmatprep.mubr.f32.mxu1 %v388_v51  ;;  %v427_v51 = vunpack.c.l.bf16 %v316_v45  ;;  %v432_v42 = vunpack.c.h.bf16 %v318_v41 }
  0xd1   : > { %687 = vmatmul.mubr.f32.gmra.mrb[26].mxu0 %v385_v53  ;;  %v319_v53 = vld [vmem:[%s1817_s6 + $0x190] sm:$0xff] }
  0xd2   : > { %912 = vmatmul.mubr.f32.gmra.mrb[26].mxu1 %v387_v54  ;;  %691 = vmatprep.mubr.f32.mxu0 %v390_v55  ;;  %v320_v54 = vld [vmem:[%s1817_s6 + $0x198] sm:$0xff]  ;;  %v429_v55 = vunpack.c.l.bf16 %v317_v49  ;;  %v434_v57 = vunpack.c.h.bf16 %v319_v53 }
  0xd3   : > { %916 = vmatprep.mubr.f32.mxu1 %v392_v56  ;;  %v431_v56 = vunpack.c.l.bf16 %v318_v41  ;;  %v436_v58 = vunpack.c.h.bf16 %v320_v54 }
  0xd5   : > { %692 = vmatmul.mubr.f32.gmra.mrb[28].mxu0 %v389_v59  ;;  %v321_v59 = vld [vmem:[%s1817_s6 + $0x1a0] sm:$0xff] }
  0xd6   : > { %917 = vmatmul.mubr.f32.gmra.mrb[28].mxu1 %v391_v60  ;;  %696 = vmatprep.mubr.f32.mxu0 %v394_v61  ;;  %v322_v60 = vld [vmem:[%s1817_s6 + $0x1a8] sm:$0xff]  ;;  %v433_v61 = vunpack.c.l.bf16 %v319_v53  ;;  %v438_v63 = vunpack.c.h.bf16 %v321_v59 }
  0xd7   : > { %921 = vmatprep.mubr.f32.mxu1 %v396_v62  ;;  %v435_v62 = vunpack.c.l.bf16 %v320_v54  ;;  %v440_v1 = vunpack.c.h.bf16 %v322_v60 }
  0xd9   : > { %697 = vmatmul.mubr.f32.gmra.mrb[30].mxu0 %v393_v2  ;;  %v323_v2 = vld [vmem:[%s1817_s6 + $0x1b0] sm:$0xff] }
  0xda   : > { %922 = vmatmul.mubr.f32.gmra.mrb[30].mxu1 %v395_v3  ;;  %701 = vmatprep.mubr.f32.mxu0 %v398_v4  ;;  %v324_v3 = vld [vmem:[%s1817_s6 + $0x1b8] sm:$0xff]  ;;  %v437_v4 = vunpack.c.l.bf16 %v321_v59  ;;  %v442_v6 = vunpack.c.h.bf16 %v323_v2 }
  0xdb   : > { %926 = vmatprep.mubr.f32.mxu1 %v400_v5  ;;  %v439_v5 = vunpack.c.l.bf16 %v322_v60  ;;  %v444_v7 = vunpack.c.h.bf16 %v324_v3 }
  0xdd   : > { %702 = vmatmul.mubr.f32.gmra.mrb[32].mxu0 %v397_v8  ;;  %v325_v8 = vld [vmem:[%s1817_s6 + $0x1c0] sm:$0xff] }
  0xde   : > { %927 = vmatmul.mubr.f32.gmra.mrb[32].mxu1 %v399_v9  ;;  %706 = vmatprep.mubr.f32.mxu0 %v402_v10  ;;  %v326_v9 = vld [vmem:[%s1817_s6 + $0x1c8] sm:$0xff]  ;;  %v441_v10 = vunpack.c.l.bf16 %v323_v2  ;;  %v446_v12 = vunpack.c.h.bf16 %v325_v8 }
  0xdf   : > { %931 = vmatprep.mubr.f32.mxu1 %v404_v11  ;;  %v443_v11 = vunpack.c.l.bf16 %v324_v3  ;;  %v448_v13 = vunpack.c.h.bf16 %v326_v9 }
  0xe1   : > { %707 = vmatmul.mubr.f32.gmra.mrb[34].mxu0 %v401_v14  ;;  %v327_v14 = vld [vmem:[%s1817_s6 + $0x1d0] sm:$0xff] }
  0xe2   : > { %932 = vmatmul.mubr.f32.gmra.mrb[34].mxu1 %v403_v15  ;;  %711 = vmatprep.mubr.f32.mxu0 %v406_v16  ;;  %v328_v15 = vld [vmem:[%s1817_s6 + $0x1d8] sm:$0xff]  ;;  %v445_v16 = vunpack.c.l.bf16 %v325_v8  ;;  %v450_v18 = vunpack.c.h.bf16 %v327_v14 }
  0xe3   : > { %936 = vmatprep.mubr.f32.mxu1 %v408_v17  ;;  %v447_v17 = vunpack.c.l.bf16 %v326_v9  ;;  %v452_v19 = vunpack.c.h.bf16 %v328_v15 }
  0xe5   : > { %712 = vmatmul.mubr.f32.gmra.mrb[36].mxu0 %v405_v20  ;;  %v329_v20 = vld [vmem:[%s1817_s6 + $0x1e0] sm:$0xff] }
  0xe6   : > { %937 = vmatmul.mubr.f32.gmra.mrb[36].mxu1 %v407_v21  ;;  %716 = vmatprep.mubr.f32.mxu0 %v410_v22  ;;  %v330_v21 = vld [vmem:[%s1817_s6 + $0x1e8] sm:$0xff]  ;;  %v449_v22 = vunpack.c.l.bf16 %v327_v14  ;;  %v454_v24 = vunpack.c.h.bf16 %v329_v20 }
  0xe7   : > { %941 = vmatprep.mubr.f32.mxu1 %v412_v23  ;;  %v451_v23 = vunpack.c.l.bf16 %v328_v15  ;;  %v456_v25 = vunpack.c.h.bf16 %v330_v21 }
  0xe9   : > { %717 = vmatmul.mubr.f32.gmra.mrb[38].mxu0 %v409_v26  ;;  %v331_v26 = vld [vmem:[%s1817_s6 + $0x1f0] sm:$0xff] }
  0xea   : > { %942 = vmatmul.mubr.f32.gmra.mrb[38].mxu1 %v411_v27  ;;  %721 = vmatprep.mubr.f32.mxu0 %v414_v28  ;;  %v332_v27 = vld [vmem:[%s1817_s6 + $0x1f8] sm:$0xff]  ;;  %v453_v28 = vunpack.c.l.bf16 %v329_v20  ;;  %v458_v30 = vunpack.c.h.bf16 %v331_v26 }
  0xeb   : > { %946 = vmatprep.mubr.f32.mxu1 %v416_v29  ;;  %v455_v29 = vunpack.c.l.bf16 %v330_v21  ;;  %v460_v31 = vunpack.c.h.bf16 %v332_v27 }
  0xed   : > { %722 = vmatmul.mubr.f32.gmra.mrb[40].mxu0 %v413_v32  ;;  %v457_v32 = vunpack.c.l.bf16 %v331_v26 }
  0xee   : > { %947 = vmatmul.mubr.f32.gmra.mrb[40].mxu1 %v415_v33  ;;  %726 = vmatprep.mubr.f32.mxu0 %v418_v34  ;;  %v459_v33 = vunpack.c.l.bf16 %v332_v27 }
  0xef   : > { %951 = vmatprep.mubr.f32.mxu1 %v420_v35 }
  0xf1   : > { %727 = vmatmul.mubr.f32.gmra.mrb[42].mxu0 %v417_v38 }
  0xf2   : > { %952 = vmatmul.mubr.f32.gmra.mrb[42].mxu1 %v419_v39  ;;  %731 = vmatprep.mubr.f32.mxu0 %v422_v40 }
  0xf3   : > { %956 = vmatprep.mubr.f32.mxu1 %v424_v43 }
  0xf5   : > { %732 = vmatmul.mubr.f32.gmra.mrb[44].mxu0 %v421_v46 }
  0xf6   : > { %957 = vmatmul.mubr.f32.gmra.mrb[44].mxu1 %v423_v47  ;;  %736 = vmatprep.mubr.f32.mxu0 %v426_v48 }
  0xf7   : > { %961 = vmatprep.mubr.f32.mxu1 %v428_v0 }
  0xf9   : > { %737 = vmatmul.mubr.f32.gmra.mrb[46].mxu0 %v425_v50 }
  0xfa   : > { %962 = vmatmul.mubr.f32.gmra.mrb[46].mxu1 %v427_v51  ;;  %741 = vmatprep.mubr.f32.mxu0 %v430_v52 }
  0xfb   : > { %966 = vmatprep.mubr.f32.mxu1 %v432_v42 }
  0xfd   : > { %742 = vmatmul.mubr.f32.gmra.mrb[48].mxu0 %v429_v55 }
  0xfe   : > { %967 = vmatmul.mubr.f32.gmra.mrb[48].mxu1 %v431_v56  ;;  %746 = vmatprep.mubr.f32.mxu0 %v434_v57 }
  0xff   : > { %971 = vmatprep.mubr.f32.mxu1 %v436_v58 }
 0x101   : > { %747 = vmatmul.mubr.f32.gmra.mrb[50].mxu0 %v433_v61 }
 0x102   : > { %972 = vmatmul.mubr.f32.gmra.mrb[50].mxu1 %v435_v62  ;;  %751 = vmatprep.mubr.f32.mxu0 %v438_v63 }
 0x103   : > { %976 = vmatprep.mubr.f32.mxu1 %v440_v1 }
 0x105   : > { %752 = vmatmul.mubr.f32.gmra.mrb[52].mxu0 %v437_v4 }
 0x106   : > { %977 = vmatmul.mubr.f32.gmra.mrb[52].mxu1 %v439_v5  ;;  %756 = vmatprep.mubr.f32.mxu0 %v442_v6 }
 0x107   : > { %981 = vmatprep.mubr.f32.mxu1 %v444_v7 }
 0x109   : > { %757 = vmatmul.mubr.f32.gmra.mrb[54].mxu0 %v441_v10 }
 0x10a   : > { %982 = vmatmul.mubr.f32.gmra.mrb[54].mxu1 %v443_v11  ;;  %761 = vmatprep.mubr.f32.mxu0 %v446_v12 }
 0x10b   : > { %986 = vmatprep.mubr.f32.mxu1 %v448_v13 }
 0x10d   : > { %762 = vmatmul.mubr.f32.gmra.mrb[56].mxu0 %v445_v16 }
 0x10e   : > { %987 = vmatmul.mubr.f32.gmra.mrb[56].mxu1 %v447_v17  ;;  %766 = vmatprep.mubr.f32.mxu0 %v450_v18 }
 0x10f   : > { %991 = vmatprep.mubr.f32.mxu1 %v452_v19 }
 0x111   : > { %767 = vmatmul.mubr.f32.gmra.mrb[58].mxu0 %v449_v22 }
 0x112   : > { %992 = vmatmul.mubr.f32.gmra.mrb[58].mxu1 %v451_v23  ;;  %771 = vmatprep.mubr.f32.mxu0 %v454_v24 }
 0x113   : > { %996 = vmatprep.mubr.f32.mxu1 %v456_v25 }
 0x115   : > { %772 = vmatmul.mubr.f32.gmra.mrb[60].mxu0 %v453_v28 }
 0x116   : > { %997 = vmatmul.mubr.f32.gmra.mrb[60].mxu1 %v455_v29  ;;  %776 = vmatprep.mubr.f32.mxu0 %v458_v30 }
 0x117   : > { %1001 = vmatprep.mubr.f32.mxu1 %v460_v31 }
 0x119   : > { %777 = vmatmul.mubr.f32.gmra.mrb[62].mxu0 %v457_v32 }
 0x11a   : > { %1002 = vmatmul.mubr.f32.gmra.mrb[62].mxu1 %v459_v33 }
 0x170   : > { %v623_v34 = vpop.f32.mrb[0].mxu0 }
 0x171   : > { %v848_v35 = vpop.f32.mrb[0].mxu1  ;;  %v625_v37 = vpop.f32.mrb[1].mxu0 }
 0x172   : > { %v849_v38 = vadd.f32 %v848_v35, %v623_v34  ;;  %v850_v39 = vpop.f32.mrb[1].mxu1 }
 0x174   : > { %v1113_v40 = vadd.f32 %v1935_v36, %v849_v38  ;;  %v628_v43 = vpop.f32.mrb[2].mxu0 }
 0x175   : > { %v853_v44 = vpop.f32.mrb[2].mxu1  ;;  %v630_v45 = vpop.f32.mrb[3].mxu0 }
 0x176   : > { %1145 = vst [vmem:[%s1938_s9] sm:$0xff] %v1113_v40  ;;  %v854_v46 = vadd.f32 %v853_v44, %v628_v43  ;;  %v855_v47 = vpop.f32.mrb[3].mxu1 }
 0x178   : > { %v1114_v48 = vadd.f32 %v1935_v36, %v854_v46  ;;  %v633_v0 = vpop.f32.mrb[4].mxu0 }
 0x179   : > { %v858_v49 = vpop.f32.mrb[4].mxu1  ;;  %v635_v41 = vpop.f32.mrb[5].mxu0 }
 0x17a   : > { %1146 = vst [vmem:[%s1938_s9 + $0x8] sm:$0xff] %v1114_v48  ;;  %v859_v50 = vadd.f32 %v858_v49, %v633_v0  ;;  %v860_v51 = vpop.f32.mrb[5].mxu1 }
 0x17c   : > { %v1115_v52 = vadd.f32 %v1935_v36, %v859_v50  ;;  %v638_v42 = vpop.f32.mrb[6].mxu0 }
 0x17d   : > { %v863_v53 = vpop.f32.mrb[6].mxu1  ;;  %v640_v54 = vpop.f32.mrb[7].mxu0 }
 0x17e   : > { %1147 = vst [vmem:[%s1938_s9 + $0x10] sm:$0xff] %v1115_v52  ;;  %v864_v55 = vadd.f32 %v863_v53, %v638_v42  ;;  %v865_v56 = vpop.f32.mrb[7].mxu1 }
 0x180   : > { %v1116_v57 = vadd.f32 %v1935_v36, %v864_v55  ;;  %v643_v58 = vpop.f32.mrb[8].mxu0 }
 0x181   : > { %v868_v59 = vpop.f32.mrb[8].mxu1  ;;  %v645_v60 = vpop.f32.mrb[9].mxu0 }
 0x182   : > { %1148 = vst [vmem:[%s1938_s9 + $0x18] sm:$0xff] %v1116_v57  ;;  %v869_v61 = vadd.f32 %v868_v59, %v643_v58  ;;  %v870_v62 = vpop.f32.mrb[9].mxu1 }
 0x184   : > { %v1117_v63 = vadd.f32 %v1935_v36, %v869_v61  ;;  %v648_v1 = vpop.f32.mrb[10].mxu0 }
 0x185   : > { %v873_v2 = vpop.f32.mrb[10].mxu1  ;;  %v650_v3 = vpop.f32.mrb[11].mxu0 }
 0x186   : > { %1149 = vst [vmem:[%s1938_s9 + $0x20] sm:$0xff] %v1117_v63  ;;  %v874_v4 = vadd.f32 %v873_v2, %v648_v1  ;;  %v875_v5 = vpop.f32.mrb[11].mxu1 }
 0x188   : > { %v1118_v6 = vadd.f32 %v1935_v36, %v874_v4  ;;  %v653_v7 = vpop.f32.mrb[12].mxu0 }
 0x189   : > { %v878_v8 = vpop.f32.mrb[12].mxu1  ;;  %v655_v9 = vpop.f32.mrb[13].mxu0 }
 0x18a   : > { %1150 = vst [vmem:[%s1938_s9 + $0x28] sm:$0xff] %v1118_v6  ;;  %v879_v10 = vadd.f32 %v878_v8, %v653_v7  ;;  %v880_v11 = vpop.f32.mrb[13].mxu1 }
 0x18c   : > { %v1119_v12 = vadd.f32 %v1935_v36, %v879_v10  ;;  %v658_v13 = vpop.f32.mrb[14].mxu0 }
 0x18d   : > { %v883_v14 = vpop.f32.mrb[14].mxu1  ;;  %v660_v15 = vpop.f32.mrb[15].mxu0 }
 0x18e   : > { %1151 = vst [vmem:[%s1938_s9 + $0x30] sm:$0xff] %v1119_v12  ;;  %v884_v16 = vadd.f32 %v883_v14, %v658_v13  ;;  %v885_v17 = vpop.f32.mrb[15].mxu1 }
 0x190   : > { %v1120_v18 = vadd.f32 %v1935_v36, %v884_v16  ;;  %v663_v19 = vpop.f32.mrb[16].mxu0 }
 0x191   : > { %v888_v20 = vpop.f32.mrb[16].mxu1  ;;  %v665_v21 = vpop.f32.mrb[17].mxu0 }
 0x192   : > { %1152 = vst [vmem:[%s1938_s9 + $0x38] sm:$0xff] %v1120_v18  ;;  %v889_v22 = vadd.f32 %v888_v20, %v663_v19  ;;  %v890_v23 = vpop.f32.mrb[17].mxu1 }
 0x194   : > { %v1121_v24 = vadd.f32 %v1935_v36, %v889_v22  ;;  %v668_v25 = vpop.f32.mrb[18].mxu0 }
 0x195   : > { %v893_v26 = vpop.f32.mrb[18].mxu1  ;;  %v670_v27 = vpop.f32.mrb[19].mxu0 }
 0x196   : > { %1153 = vst [vmem:[%s1938_s9 + $0x40] sm:$0xff] %v1121_v24  ;;  %v894_v28 = vadd.f32 %v893_v26, %v668_v25  ;;  %v895_v29 = vpop.f32.mrb[19].mxu1 }
 0x198   : > { %v1122_v30 = vadd.f32 %v1935_v36, %v894_v28  ;;  %v673_v31 = vpop.f32.mrb[20].mxu0 }
 0x199   : > { %v898_v32 = vpop.f32.mrb[20].mxu1  ;;  %v675_v33 = vpop.f32.mrb[21].mxu0 }
 0x19a   : > { %1154 = vst [vmem:[%s1938_s9 + $0x48] sm:$0xff] %v1122_v30  ;;  %v899_v34 = vadd.f32 %v898_v32, %v673_v31  ;;  %v900_v35 = vpop.f32.mrb[21].mxu1 }
 0x19c   : > { %v1123_v37 = vadd.f32 %v1935_v36, %v899_v34  ;;  %v678_v38 = vpop.f32.mrb[22].mxu0 }
 0x19d   : > { %v903_v39 = vpop.f32.mrb[22].mxu1  ;;  %v680_v40 = vpop.f32.mrb[23].mxu0 }
 0x19e   : > { %1155 = vst [vmem:[%s1938_s9 + $0x50] sm:$0xff] %v1123_v37  ;;  %v904_v43 = vadd.f32 %v903_v39, %v678_v38  ;;  %v905_v44 = vpop.f32.mrb[23].mxu1 }
 0x1a0   : > { %v1124_v45 = vadd.f32 %v1935_v36, %v904_v43  ;;  %v683_v46 = vpop.f32.mrb[24].mxu0 }
 0x1a1   : > { %v908_v47 = vpop.f32.mrb[24].mxu1  ;;  %v685_v48 = vpop.f32.mrb[25].mxu0 }
 0x1a2   : > { %1156 = vst [vmem:[%s1938_s9 + $0x58] sm:$0xff] %v1124_v45  ;;  %v909_v0 = vadd.f32 %v908_v47, %v683_v46  ;;  %v910_v49 = vpop.f32.mrb[25].mxu1 }
 0x1a4   : > { %v1125_v41 = vadd.f32 %v1935_v36, %v909_v0  ;;  %v688_v50 = vpop.f32.mrb[26].mxu0 }
 0x1a5   : > { %v913_v51 = vpop.f32.mrb[26].mxu1  ;;  %v690_v52 = vpop.f32.mrb[27].mxu0 }
 0x1a6   : > { %1157 = vst [vmem:[%s1938_s9 + $0x60] sm:$0xff] %v1125_v41  ;;  %v914_v42 = vadd.f32 %v913_v51, %v688_v50  ;;  %v915_v53 = vpop.f32.mrb[27].mxu1 }
 0x1a8   : > { %v1126_v54 = vadd.f32 %v1935_v36, %v914_v42  ;;  %v693_v55 = vpop.f32.mrb[28].mxu0 }
 0x1a9   : > { %v918_v56 = vpop.f32.mrb[28].mxu1  ;;  %v695_v57 = vpop.f32.mrb[29].mxu0 }
 0x1aa   : > { %1158 = vst [vmem:[%s1938_s9 + $0x68] sm:$0xff] %v1126_v54  ;;  %v919_v58 = vadd.f32 %v918_v56, %v693_v55  ;;  %v920_v59 = vpop.f32.mrb[29].mxu1 }
 0x1ac   : > { %v1127_v60 = vadd.f32 %v1935_v36, %v919_v58  ;;  %v698_v61 = vpop.f32.mrb[30].mxu0 }
 0x1ad   : > { %v923_v62 = vpop.f32.mrb[30].mxu1  ;;  %v700_v63 = vpop.f32.mrb[31].mxu0 }
 0x1ae   : > { %1159 = vst [vmem:[%s1938_s9 + $0x70] sm:$0xff] %v1127_v60  ;;  %v924_v1 = vadd.f32 %v923_v62, %v698_v61  ;;  %v925_v2 = vpop.f32.mrb[31].mxu1 }
 0x1b0   : > { %v1128_v3 = vadd.f32 %v1935_v36, %v924_v1  ;;  %v703_v4 = vpop.f32.mrb[32].mxu0 }
 0x1b1   : > { %v928_v5 = vpop.f32.mrb[32].mxu1  ;;  %v705_v6 = vpop.f32.mrb[33].mxu0 }
 0x1b2   : > { %1160 = vst [vmem:[%s1938_s9 + $0x78] sm:$0xff] %v1128_v3  ;;  %v929_v7 = vadd.f32 %v928_v5, %v703_v4  ;;  %v930_v8 = vpop.f32.mrb[33].mxu1 }
 0x1b4   : > { %v1129_v9 = vadd.f32 %v1935_v36, %v929_v7  ;;  %v708_v10 = vpop.f32.mrb[34].mxu0 }
 0x1b5   : > { %v933_v11 = vpop.f32.mrb[34].mxu1  ;;  %v710_v12 = vpop.f32.mrb[35].mxu0 }
 0x1b6   : > { %1161 = vst [vmem:[%s1938_s9 + $0x80] sm:$0xff] %v1129_v9  ;;  %v934_v13 = vadd.f32 %v933_v11, %v708_v10  ;;  %v935_v14 = vpop.f32.mrb[35].mxu1 }
 0x1b8   : > { %v1130_v15 = vadd.f32 %v1935_v36, %v934_v13  ;;  %v713_v16 = vpop.f32.mrb[36].mxu0 }
 0x1b9   : > { %v938_v17 = vpop.f32.mrb[36].mxu1  ;;  %v715_v18 = vpop.f32.mrb[37].mxu0 }
 0x1ba   : > { %1162 = vst [vmem:[%s1938_s9 + $0x88] sm:$0xff] %v1130_v15  ;;  %v939_v19 = vadd.f32 %v938_v17, %v713_v16  ;;  %v940_v20 = vpop.f32.mrb[37].mxu1 }
 0x1bc   : > { %v1131_v21 = vadd.f32 %v1935_v36, %v939_v19  ;;  %v718_v22 = vpop.f32.mrb[38].mxu0 }
 0x1bd   : > { %v943_v23 = vpop.f32.mrb[38].mxu1  ;;  %v720_v24 = vpop.f32.mrb[39].mxu0 }
 0x1be   : > { %1163 = vst [vmem:[%s1938_s9 + $0x90] sm:$0xff] %v1131_v21  ;;  %v944_v25 = vadd.f32 %v943_v23, %v718_v22  ;;  %v945_v26 = vpop.f32.mrb[39].mxu1 }
 0x1c0   : > { %v1132_v27 = vadd.f32 %v1935_v36, %v944_v25  ;;  %v723_v28 = vpop.f32.mrb[40].mxu0 }
 0x1c1   : > { %v948_v29 = vpop.f32.mrb[40].mxu1  ;;  %v725_v30 = vpop.f32.mrb[41].mxu0 }
 0x1c2   : > { %1164 = vst [vmem:[%s1938_s9 + $0x98] sm:$0xff] %v1132_v27  ;;  %v949_v31 = vadd.f32 %v948_v29, %v723_v28  ;;  %v950_v32 = vpop.f32.mrb[41].mxu1 }
 0x1c4   : > { %v1133_v33 = vadd.f32 %v1935_v36, %v949_v31  ;;  %v728_v34 = vpop.f32.mrb[42].mxu0 }
 0x1c5   : > { %v953_v35 = vpop.f32.mrb[42].mxu1  ;;  %v730_v37 = vpop.f32.mrb[43].mxu0 }
 0x1c6   : > { %1165 = vst [vmem:[%s1938_s9 + $0xa0] sm:$0xff] %v1133_v33  ;;  %v954_v38 = vadd.f32 %v953_v35, %v728_v34  ;;  %v955_v39 = vpop.f32.mrb[43].mxu1 }
 0x1c8   : > { %v1134_v40 = vadd.f32 %v1935_v36, %v954_v38  ;;  %v733_v43 = vpop.f32.mrb[44].mxu0 }
 0x1c9   : > { %v958_v44 = vpop.f32.mrb[44].mxu1  ;;  %v735_v45 = vpop.f32.mrb[45].mxu0 }
 0x1ca   : > { %1166 = vst [vmem:[%s1938_s9 + $0xa8] sm:$0xff] %v1134_v40  ;;  %v959_v46 = vadd.f32 %v958_v44, %v733_v43  ;;  %v960_v47 = vpop.f32.mrb[45].mxu1 }
 0x1cc   : > { %v1135_v48 = vadd.f32 %v1935_v36, %v959_v46  ;;  %v738_v0 = vpop.f32.mrb[46].mxu0 }
 0x1cd   : > { %v963_v49 = vpop.f32.mrb[46].mxu1  ;;  %v740_v41 = vpop.f32.mrb[47].mxu0 }
 0x1ce   : > { %1167 = vst [vmem:[%s1938_s9 + $0xb0] sm:$0xff] %v1135_v48  ;;  %v964_v50 = vadd.f32 %v963_v49, %v738_v0  ;;  %v965_v51 = vpop.f32.mrb[47].mxu1 }
 0x1d0   : > { %v1136_v52 = vadd.f32 %v1935_v36, %v964_v50  ;;  %v743_v42 = vpop.f32.mrb[48].mxu0 }
 0x1d1   : > { %v968_v53 = vpop.f32.mrb[48].mxu1  ;;  %v745_v54 = vpop.f32.mrb[49].mxu0 }
 0x1d2   : > { %1168 = vst [vmem:[%s1938_s9 + $0xb8] sm:$0xff] %v1136_v52  ;;  %v969_v55 = vadd.f32 %v968_v53, %v743_v42  ;;  %v970_v56 = vpop.f32.mrb[49].mxu1 }
 0x1d4   : > { %v1137_v57 = vadd.f32 %v1935_v36, %v969_v55  ;;  %v748_v58 = vpop.f32.mrb[50].mxu0 }
 0x1d5   : > { %v973_v59 = vpop.f32.mrb[50].mxu1  ;;  %v750_v60 = vpop.f32.mrb[51].mxu0 }
 0x1d6   : > { %1169 = vst [vmem:[%s1938_s9 + $0xc0] sm:$0xff] %v1137_v57  ;;  %v974_v61 = vadd.f32 %v973_v59, %v748_v58  ;;  %v975_v62 = vpop.f32.mrb[51].mxu1 }
 0x1d8   : > { %v1138_v63 = vadd.f32 %v1935_v36, %v974_v61  ;;  %v753_v1 = vpop.f32.mrb[52].mxu0 }
 0x1d9   : > { %v978_v2 = vpop.f32.mrb[52].mxu1  ;;  %v755_v3 = vpop.f32.mrb[53].mxu0 }
 0x1da   : > { %1170 = vst [vmem:[%s1938_s9 + $0xc8] sm:$0xff] %v1138_v63  ;;  %v979_v4 = vadd.f32 %v978_v2, %v753_v1  ;;  %v980_v5 = vpop.f32.mrb[53].mxu1 }
 0x1dc   : > { %v1139_v6 = vadd.f32 %v1935_v36, %v979_v4  ;;  %v758_v7 = vpop.f32.mrb[54].mxu0 }
 0x1dd   : > { %v983_v8 = vpop.f32.mrb[54].mxu1  ;;  %v760_v9 = vpop.f32.mrb[55].mxu0 }
 0x1de   : > { %1171 = vst [vmem:[%s1938_s9 + $0xd0] sm:$0xff] %v1139_v6  ;;  %v984_v10 = vadd.f32 %v983_v8, %v758_v7  ;;  %v985_v11 = vpop.f32.mrb[55].mxu1 }
 0x1e0   : > { %v1140_v12 = vadd.f32 %v1935_v36, %v984_v10  ;;  %v763_v13 = vpop.f32.mrb[56].mxu0 }
 0x1e1   : > { %v988_v14 = vpop.f32.mrb[56].mxu1  ;;  %v765_v15 = vpop.f32.mrb[57].mxu0 }
 0x1e2   : > { %1172 = vst [vmem:[%s1938_s9 + $0xd8] sm:$0xff] %v1140_v12  ;;  %v989_v16 = vadd.f32 %v988_v14, %v763_v13  ;;  %v990_v17 = vpop.f32.mrb[57].mxu1 }
 0x1e4   : > { %v1141_v18 = vadd.f32 %v1935_v36, %v989_v16  ;;  %v768_v19 = vpop.f32.mrb[58].mxu0 }
 0x1e5   : > { %v993_v20 = vpop.f32.mrb[58].mxu1  ;;  %v770_v21 = vpop.f32.mrb[59].mxu0 }
 0x1e6   : > { %1173 = vst [vmem:[%s1938_s9 + $0xe0] sm:$0xff] %v1141_v18  ;;  %v994_v22 = vadd.f32 %v993_v20, %v768_v19  ;;  %v995_v23 = vpop.f32.mrb[59].mxu1 }
 0x1e8   : > { %v1142_v24 = vadd.f32 %v1935_v36, %v994_v22  ;;  %v773_v25 = vpop.f32.mrb[60].mxu0 }
 0x1e9   : > { %v998_v26 = vpop.f32.mrb[60].mxu1  ;;  %v775_v27 = vpop.f32.mrb[61].mxu0 }
 0x1ea   : > { %1174 = vst [vmem:[%s1938_s9 + $0xe8] sm:$0xff] %v1142_v24  ;;  %v999_v28 = vadd.f32 %v998_v26, %v773_v25  ;;  %v1000_v29 = vpop.f32.mrb[61].mxu1 }
 0x1ec   : > { %v1143_v30 = vadd.f32 %v1935_v36, %v999_v28  ;;  %v778_v31 = vpop.f32.mrb[62].mxu0 }
 0x1ed   : > { %v1003_v32 = vpop.f32.mrb[62].mxu1  ;;  %v780_v33 = vpop.f32.mrb[63].mxu0 }
 0x1ee   : > { %1175 = vst [vmem:[%s1938_s9 + $0xf0] sm:$0xff] %v1143_v30  ;;  %v1004_v34 = vadd.f32 %v1003_v32, %v778_v31  ;;  %v1005_v35 = vpop.f32.mrb[63].mxu1 }
 0x1f0   : > { %v1144_v37 = vadd.f32 %v1935_v36, %v1004_v34 }
 0x1f2   : > { %1176 = vst [vmem:[%s1938_s9 + $0xf8] sm:$0xff] %v1144_v37 }
 0x1f3   : > { %1556 = shalt.err (!%p1553_p5)
}
 0x1f4   : > { %s1557_s29 = scalar_lea.hbm %s2006_s7, 4096  ;;  %s1561_s20 = scalar_lea.hbm %s2062_s3, 8192 }
 0x1f5   : > { %p1558_p9 = scmp.ne.s32.totalorder %s2006_s7, %s1557_s29  ;;  %p1562_p3 = scmp.lt.u32.totalorder %s2006_s7, %s2062_s3 }
 0x1f6   : > { %p1563_p7 = scmp.lt.u32.totalorder %s1561_s20, %s1557_s29  ;;  %p1565_p4 = scmp.lt.u32.totalorder %s1557_s29, %s2006_s7 }
 0x1f7   : > { %p1559_p1 = pnand %p1558_p9, %p1757_p10 }
 0x1f8   : > { %p1564_p13 = por %p1563_p7, %p1562_p3 }
 0x1f9   : > { %p1560_p2 = pneg %p1559_p1 }
 0x1fa   : > { %p1566_p6 = por %p1565_p4, %p1564_p13 }
 0x1fc   : > { %p1567_p8 = pnand %p1566_p6, %p1560_p2 }
 0x1fe   : > { %1570 = shalt.err (!%p1567_p8)
}
 0x1ff   : > { %s1639_s9 = smov 128   ;;  %s1640_s10 = smov 8  }
 0x200   : > { %1411 = dma.vmem_to_hbm [thread:$0]  (%p1757_p10), %s2008_s11, 4096, %s2006_s7, %s1178_s15, %s1639_s9, %s1639_s9, %s1640_s10  }
 0x201 PF: > { %s1206_s18 = sand.u32 1, %s1609_s12   ;;  %p2080_p12 = scmp.ne.s32.totalorder %s2070_s23, 0 }
 0x202   : > { %p2081_p11 = scmp.ge.s32.totalorder %s1629_s17, 2  ;;  %s1207_s26 = scalar_lea.sflag [#allocation5], %s1206_s18 }
 0x204   : > { %p1422_p0 = pnand %p2081_p11, %p2080_p12 }
 0x206   : > { %1604 = dma.done.wait (!%p1422_p0), %s1207_s26, 4096  }
 0x207   : > { %1606 = vsyncadd (!%p1422_p0), %s1207_s26, 4294963200  ;;  %s20_s17 = sadd.s32 1, %s1629_s17   ;;  %s2082_s12 = smov %s1613_s13 }
 0x208   : > { %p17_p5 = scmp.ge.s32.totalorder %s20_s17, 4   ;;  %s2083_s13 = smov %s1617_s14 }
 0x209   : > { %s2084_s14 = smov %s1766_s5  ;;  %s2085_s15 = smov %s1625_s16 }
 0x20a   : > { %s2086_s16 = smov %s2088_s28  ;;  %19 = sbr.rel (!%p17_p5) target bundleno = 7 (0x7), region = 90 }
 0x211   :  { %1212 = vsyncpa [#allocation4], 1 }
 0x212   :  { %1214 = vsyncpa [#allocation4 + $0x1], 1 }
 0x213   :  { %1215 = vsyncpa [#allocation7], 1 }
 0x214   :  { %1216 = vsyncpa [#allocation5], 1 }
 0x215   :  { %1218 = vsyncpa [#allocation5 + $0x1], 1 }

</bundles_post_ra>
